<compile_context>
chip_gen: v7x
topology: tpu7x:2x2x1
jax: 0.10.0
libtpu: 0.0.40
codegen_flags: <defaults>
</compile_context>

<pallas_src>
import functools

import jax
import jax.numpy as jnp
from jax import lax
from jax.experimental import pallas as pl
from jax.experimental.pallas import tpu as pltpu

_LANE = 128
# Safe on every generation (<= scoped/physical VMEM of v5e/v6e/v7x) while
# raising v5e's 16 MiB scoped default.
_VMEM_LIMIT = 32 * 1024 * 1024


# ---------------------------------------------------------------------------
# small helpers
# ---------------------------------------------------------------------------
def _round_up(x, m):
    return ((x + m - 1) // m) * m


def _pad_axis(a, axis, new_size):
    pad = new_size - a.shape[axis]
    if pad == 0:
        return a
    cfg = [(0, 0)] * a.ndim
    cfg[axis] = (0, pad)
    return jnp.pad(a, cfg)


def _fold_bn(w, gamma, beta, mean, var, eps):
    """Fold eval-mode BN into the conv weight / bias (f32)."""
    scale = gamma / jnp.sqrt(var + eps)
    w_eff = (w * scale[:, None, None, None]).astype(jnp.float32)
    bias = (beta - mean * scale).astype(jnp.float32)
    return w_eff, bias


def _pick_tm(m, cap=512):
    """Largest multiple of 8 that divides m, <= cap, with >= 2 grid steps."""
    best = None
    t = 8
    while t <= min(cap, m // 2):
        if m % t == 0:
            best = t
        t += 8
    return best


def _pick_ctile(cp, cap):
    """Largest multiple of 128 dividing cp, capped at `cap`."""
    best = _LANE
    for cand in range(_LANE, min(cp, cap) + 1, _LANE):
        if cp % cand == 0:
            best = cand
    return best


# ---------------------------------------------------------------------------
# Kernel A: 1x1 conv (as matmul) + folded-BN bias + optional ReLU
# ---------------------------------------------------------------------------
def _mm_bias_kernel(x_ref, w_ref, b_ref, o_ref, *, relu):
    acc = jnp.dot(x_ref[...], w_ref[...], preferred_element_type=jnp.float32)
    acc = acc + b_ref[...]
    if relu:
        acc = jnp.maximum(acc, 0.0)
    o_ref[...] = acc.astype(o_ref.dtype)


def _conv1x1_bn_act(x2d, w_mat, bias, *, relu, out_dtype, tm):
    mp, kp = x2d.shape
    cp = w_mat.shape[1]
    return pl.pallas_call(
        functools.partial(_mm_bias_kernel, relu=relu),
        out_shape=jax.ShapeDtypeStruct((mp, cp), out_dtype),
        grid=(mp // tm,),
        in_specs=[pl.BlockSpec((tm, kp), lambda i: (i, 0)),
                  pl.BlockSpec((kp, cp), lambda i: (0, 0)),
                  pl.BlockSpec((1, cp), lambda i: (0, 0))],
        out_specs=pl.BlockSpec((tm, cp), lambda i: (i, 0)),
        compiler_params=pltpu.CompilerParams(
            dimension_semantics=("parallel",),
            vmem_limit_bytes=_VMEM_LIMIT),
    )(x2d, w_mat, bias)


# ---------------------------------------------------------------------------
# Kernel B: 3x3 dilated conv + folded-BN bias + ReLU
#   grid = (N, OH//TR, mid_p//CT); one halo'd row slab per (n, row-tile) is
#   manually DMA'd from HBM into a double-buffered VMEM scratch (prefetching
#   the next row tile of the same image), and the 3 kw taps are folded into
#   the contraction (K = 3*mid_p) so each row tile is 3 MXU pushes.
# ---------------------------------------------------------------------------
def _conv3x3_kernel(w_ref, b_ref, x_any, o_ref, slab, sem, *, dil, tr, ow):
    n = pl.program_id(0)
    t = pl.program_id(1)
    cq = pl.program_id(2)
    n_rt = pl.num_programs(1)
    trh = tr + 2 * dil
    slot = t % 2

    def slab_copy(tt, sl):
        return pltpu.make_async_copy(
            x_any.at[n, pl.ds(tt * tr, trh)], slab.at[sl], sem.at[sl])

    # Prime the first row tile of this image.
    @pl.when(jnp.logical_and(cq == 0, t == 0))
    def _():
        slab_copy(t, slot).start()

    # Prefetch the next row tile of the same image into the other slot so the
    # HBM read overlaps with this tile's compute.
    @pl.when(jnp.logical_and(cq == 0, t + 1 < n_rt))
    def _():
        slab_copy(t + 1, 1 - slot).start()

    # Wait for the current slab (only once per row tile).
    @pl.when(cq == 0)
    def _():
        slab_copy(t, slot).wait()

    buf = slab.at[slot]                       # (trh, ow+2d, mid_p) bf16 view
    ct = o_ref.shape[-1]
    acc = jnp.zeros((tr * ow, ct), jnp.float32)
    for kh in range(3):                       # row taps: vreg-granular slices
        taps = [buf[kh * dil:kh * dil + tr, kw * dil:kw * dil + ow, :]
                for kw in range(3)]
        lhs = jnp.concatenate(taps, axis=-1).reshape(tr * ow, -1)
        acc = acc + jnp.dot(lhs, w_ref[kh], preferred_element_type=jnp.float32)
    acc = jnp.maximum(acc + b_ref[...], 0.0)
    o_ref[0] = acc.reshape(tr, ow, ct).astype(o_ref.dtype)


def _conv3x3_bn_relu(h1, w_kfold, bias, *, dilation, out_dtype):
    # h1: (N, OH, OW, mid_p) bf16; w_kfold: (3, 3*mid_p, mid_p) bf16;
    # bias: (1, mid_p) f32
    n, oh, ow, cp = h1.shape
    d = dilation
    c_tile = _pick_ctile(cp, 256)

    # Row tile: largest divisor of OH keeping the f32 accumulator modest.
    tr = 1
    for cand in range(min(16, oh), 0, -1):
        if oh % cand == 0 and cand * ow * c_tile * 4 <= 512 * 1024:
            tr = cand
            break
    trh = tr + 2 * d
    owp = ow + 2 * d
    n_rt = oh // tr
    n_cq = cp // c_tile

    # TODO(synk): spatial zero-pad of h1 is an XLA pass; could be folded into
    # the slab DMA with edge masking.
    h1p = jnp.pad(h1, ((0, 0), (d, d), (d, d), (0, 0)))

    return pl.pallas_call(
        functools.partial(_conv3x3_kernel, dil=d, tr=tr, ow=ow),
        out_shape=jax.ShapeDtypeStruct((n, oh, ow, cp), out_dtype),
        grid=(n, n_rt, n_cq),
        in_specs=[pl.BlockSpec((3, 3 * cp, c_tile), lambda i, j, c: (0, 0, c)),
                  pl.BlockSpec((1, c_tile), lambda i, j, c: (0, c)),
                  pl.BlockSpec(memory_space=pl.ANY)],
        out_specs=pl.BlockSpec((1, tr, ow, c_tile),
                               lambda i, j, c: (i, j, 0, c)),
        scratch_shapes=[pltpu.VMEM((2, trh, owp, cp), h1.dtype),
                        pltpu.SemaphoreType.DMA((2,))],
        compiler_params=pltpu.CompilerParams(
            dimension_semantics=("parallel", "arbitrary", "arbitrary"),
            vmem_limit_bytes=_VMEM_LIMIT),
    )(w_kfold, bias, h1p)


# ---------------------------------------------------------------------------
# Kernel C: increase (1x1) + shortcut + residual add + final ReLU, fused,
# tiled over (rows, out channels).
# ---------------------------------------------------------------------------
def _increase_add_ds_kernel(h_ref, w3_ref, b3_ref, x_ref, ws_ref, bs_ref, o_ref):
    acc = jnp.dot(h_ref[...], w3_ref[...], preferred_element_type=jnp.float32)
    acc = acc + b3_ref[...]
    acc = acc + jnp.dot(x_ref[...], ws_ref[...],
                        preferred_element_type=jnp.float32)
    acc = acc + bs_ref[...]
    o_ref[...] = jnp.maximum(acc, 0.0).astype(o_ref.dtype)


def _increase_add_id_kernel(h_ref, w3_ref, b3_ref, sc_ref, o_ref):
    acc = jnp.dot(h_ref[...], w3_ref[...], preferred_element_type=jnp.float32)
    acc = acc + b3_ref[...] + sc_ref[...].astype(jnp.float32)
    o_ref[...] = jnp.maximum(acc, 0.0).astype(o_ref.dtype)


# ---------------------------------------------------------------------------
# Public wrapper
# ---------------------------------------------------------------------------
def bottleneck_forward(x, params, *, stride, dilation, downsample, eps=1e-5):
    """x: (N, in_ch, H, W) f32 NCHW -> (N, out_ch, OH, OW) f32 NCHW.

    params: dict with keys "reduce", "conv3x3", "increase" (+ "shortcut" when
    downsample); each value is (w, gamma, beta, running_mean, running_var).
    """
    N, Cin, H, W = x.shape
    mid = params["reduce"][0].shape[0]
    Cout = params["increase"][0].shape[0]

    cin_p = _round_up(Cin, _LANE)
    mid_p = _round_up(mid, _LANE)
    cout_p = _round_up(Cout, _LANE)

    # NHWC, channel-pad to lane multiples, bf16 operands for the MXU.
    x_nhwc = jnp.transpose(x, (0, 2, 3, 1)).astype(jnp.float32)
    x_cinp = _pad_axis(x_nhwc, 3, cin_p).astype(jnp.bfloat16)

    # Spatial stride of the 1x1 convs == simple subsampling.
    # TODO(synk): transpose / strided subsample are XLA passes outside kernels.
    xs = x_cinp[:, ::stride, ::stride, :]
    OH, OW = xs.shape[1], xs.shape[2]
    M = N * OH * OW
    tm = _pick_tm(M)
    if tm is None:
        tm = min(512, _round_up(M, 8))
    Mp = _round_up(M, tm)                  # no-op when tm divides M
    xs2d = _pad_axis(xs.reshape(M, cin_p), 0, Mp)

    # --- fold eval-mode BN into every conv ---------------------------------
    def fold_1x1(p, k_inp, k_outp):
        w, g, b, m, v = p
        w_eff, bias = _fold_bn(w, g, b, m, v, eps)
        mat = jnp.transpose(w_eff[:, :, 0, 0], (1, 0))           # (Cin, Cout)
        mat = _pad_axis(_pad_axis(mat, 0, k_inp), 1, k_outp)
        return mat.astype(jnp.bfloat16), _pad_axis(bias[None, :], 1, k_outp)

    w1_mat, b1 = fold_1x1(params["reduce"], cin_p, mid_p)
    w3_mat, b3 = fold_1x1(params["increase"], mid_p, cout_p)

    w2, g2, be2, m2, v2 = params["conv3x3"]
    w2_eff, b2 = _fold_bn(w2, g2, be2, m2, v2, eps)
    w2_taps = jnp.transpose(w2_eff, (2, 3, 1, 0))                # (3,3,Cin,Cout)
    w2_taps = _pad_axis(_pad_axis(w2_taps, 2, mid_p), 3, mid_p)
    # Fold kw into K: row index = kw*mid_p + cin  (matches in-kernel concat).
    w2_kfold = w2_taps.reshape(3, 3 * mid_p, mid_p).astype(jnp.bfloat16)
    b2 = _pad_axis(b2[None, :], 1, mid_p)

    # --- stage 1: reduce = 1x1 conv (stride) + BN + ReLU --------------------
    h1_2d = _conv1x1_bn_act(xs2d, w1_mat, b1, relu=True,
                            out_dtype=jnp.bfloat16, tm=tm)
    h1 = h1_2d[:M].reshape(N, OH, OW, mid_p)

    # --- stage 2: 3x3 dilated conv + BN + ReLU ------------------------------
    h2 = _conv3x3_bn_relu(h1, w2_kfold, b2, dilation=dilation,
                          out_dtype=jnp.bfloat16)
    h2_2d = _pad_axis(h2.reshape(M, mid_p), 0, Mp)

    # --- stage 3: increase + shortcut + add + ReLU (fused, M/N tiled) -------
    tn = _pick_ctile(cout_p, 512)
    grid3 = (Mp // tm, cout_p // tn)
    if downsample:
        ws_mat, bs = fold_1x1(params["shortcut"], cin_p, cout_p)
        out2d = pl.pallas_call(
            _increase_add_ds_kernel,
            out_shape=jax.ShapeDtypeStruct((Mp, cout_p), jnp.float32),
            grid=grid3,
            in_specs=[pl.BlockSpec((tm, mid_p), lambda i, j: (i, 0)),
                      pl.BlockSpec((mid_p, tn), lambda i, j: (0, j)),
                      pl.BlockSpec((1, tn), lambda i, j: (0, j)),
                      pl.BlockSpec((tm, cin_p), lambda i, j: (i, 0)),
                      pl.BlockSpec((cin_p, tn), lambda i, j: (0, j)),
                      pl.BlockSpec((1, tn), lambda i, j: (0, j))],
            out_specs=pl.BlockSpec((tm, tn), lambda i, j: (i, j)),
            compiler_params=pltpu.CompilerParams(
                dimension_semantics=("parallel", "parallel"),
                vmem_limit_bytes=_VMEM_LIMIT),
        )(h2_2d, w3_mat, b3, xs2d, ws_mat, bs)
    else:
        # identity shortcut: valid only when shapes already match
        assert stride == 1 and Cin == Cout and cin_p == cout_p
        out2d = pl.pallas_call(
            _increase_add_id_kernel,
            out_shape=jax.ShapeDtypeStruct((Mp, cout_p), jnp.float32),
            grid=grid3,
            in_specs=[pl.BlockSpec((tm, mid_p), lambda i, j: (i, 0)),
                      pl.BlockSpec((mid_p, tn), lambda i, j: (0, j)),
                      pl.BlockSpec((1, tn), lambda i, j: (0, j)),
                      pl.BlockSpec((tm, tn), lambda i, j: (i, j))],
            out_specs=pl.BlockSpec((tm, tn), lambda i, j: (i, j)),
            compiler_params=pltpu.CompilerParams(
                dimension_semantics=("parallel", "parallel"),
                vmem_limit_bytes=_VMEM_LIMIT),
        )(h2_2d, w3_mat, b3, xs2d)

    out = out2d[:M].reshape(N, OH, OW, cout_p)[..., :Cout]
    return jnp.transpose(out, (0, 3, 1, 2))


# ---------------------------------------------------------------------------
# Pure-JAX reference (eval-mode BN folded, bf16-rounded operands to match the
# MXU path) to sanity-check the Pallas pipeline.
# ---------------------------------------------------------------------------
def _ref_bottleneck(x, params, *, stride, dilation, downsample, eps=1e-5):
    def cbr(h, p, s, pad, d, relu):
        w, g, b, m, v = p
        w_eff, bias = _fold_bn(w, g, b, m, v, eps)
        hb = h.astype(jnp.bfloat16).astype(jnp.float32)
        wb = w_eff.astype(jnp.bfloat16).astype(jnp.float32)
        y = lax.conv_general_dilated(
            hb, wb, window_strides=(s, s), padding=((pad, pad), (pad, pad)),
            rhs_dilation=(d, d), dimension_numbers=("NCHW", "OIHW", "NCHW"))
        y = y + bias[None, :, None, None]
        return jnp.maximum(y, 0.0) if relu else y

    h = cbr(x, params["reduce"], stride, 0, 1, True)
    h = cbr(h, params["conv3x3"], 1, dilation, dilation, True)
    h = cbr(h, params["increase"], 1, 0, 1, False)
    if downsample:
        sc = cbr(x, params["shortcut"], stride, 0, 1, False)
    else:
        sc = x.astype(jnp.bfloat16).astype(jnp.float32)
    return jnp.maximum(h + sc, 0.0)


if __name__ == "__main__":
    key = jax.random.PRNGKey(0)

    def make_cbr_params(k, cin, cout, ksz):
        kw, kg, kb, km, kv = jax.random.split(k, 5)
        return (0.1 * jax.random.normal(kw, (cout, cin, ksz, ksz), jnp.float32),
                1.0 + 0.1 * jax.random.normal(kg, (cout,), jnp.float32),
                0.1 * jax.random.normal(kb, (cout,), jnp.float32),
                0.1 * jax.random.normal(km, (cout,), jnp.float32),
                jax.random.uniform(kv, (cout,), jnp.float32, 0.5, 1.5))

    # ---- config 1: downsample bottleneck with spatial stride --------------
    N, in_ch, out_ch, H, W = 2, 16, 32, 16, 16
    mid = out_ch // 4
    k0, k1, k2, k3, k4, kx = jax.random.split(key, 6)
    x = jax.random.normal(kx, (N, in_ch, H, W), jnp.float32)
    params = {
        "reduce": make_cbr_params(k0, in_ch, mid, 1),
        "conv3x3": make_cbr_params(k1, mid, mid, 3),
        "increase": make_cbr_params(k2, mid, out_ch, 1),
        "shortcut": make_cbr_params(k3, in_ch, out_ch, 1),
    }
    out = jax.block_until_ready(
        bottleneck_forward(x, params, stride=2, dilation=1, downsample=True))
    ref = _ref_bottleneck(x, params, stride=2, dilation=1, downsample=True)
    assert out.shape == ref.shape == (N, out_ch, H // 2, W // 2), (out.shape, ref.shape)
    assert float(jnp.max(jnp.abs(out - ref))) < 3e-2

    # ---- config 2: identity shortcut with dilation -------------------------
    in_ch2 = out_ch2 = 32
    mid2 = out_ch2 // 4
    params2 = {
        "reduce": make_cbr_params(k4, in_ch2, mid2, 1),
        "conv3x3": make_cbr_params(k0, mid2, mid2, 3),
        "increase": make_cbr_params(k1, mid2, out_ch2, 1),
    }
    x2 = jax.random.normal(k2, (N, in_ch2, H, W), jnp.float32)
    out2 = jax.block_until_ready(
        bottleneck_forward(x2, params2, stride=1, dilation=2, downsample=False))
    ref2 = _ref_bottleneck(x2, params2, stride=1, dilation=2, downsample=False)
    assert out2.shape == ref2.shape == (N, out_ch2, H, W), (out2.shape, ref2.shape)
    assert float(jnp.max(jnp.abs(out2 - ref2))) < 3e-2

    print("KERNEL_OK")
</pallas_src>

<mosaic_0001>
module attributes {stable_mosaic.version = 11 : i64} {
  func.func @_mm_bias_kernel(%arg0: i32, %arg1: memref<64x128xbf16, #tpu.memory_space<vmem>>, %arg2: memref<128x128xbf16, #tpu.memory_space<vmem>>, %arg3: memref<1x128xf32, #tpu.memory_space<vmem>>, %arg4: memref<64x128xbf16, #tpu.memory_space<vmem>>) attributes {dimension_semantics = [#tpu.dimension_semantics<parallel>], iteration_bounds = array<i64: 2>, scalar_prefetch = 0 : i64, scratch_operands = 0 : i64, tpu.core_type = #tpu.core_type<tc>, window_params = [{transform_indices = @transform_0, window_bounds = array<i64: 64, 128>}, {pipeline_mode = #tpu.pipeline_mode<synchronous>, transform_indices = @transform_1, window_bounds = array<i64: 128, 128>}, {pipeline_mode = #tpu.pipeline_mode<synchronous>, transform_indices = @transform_2, window_bounds = array<i64: 1, 128>}, {transform_indices = @transform_3, window_bounds = array<i64: 64, 128>}]} {
    %c0 = arith.constant 0 : index
    %c0_0 = arith.constant 0 : index
    %0 = vector.load %arg1[%c0, %c0_0] : memref<64x128xbf16, #tpu.memory_space<vmem>>, vector<64x128xbf16>
    %c0_1 = arith.constant 0 : index
    %c0_2 = arith.constant 0 : index
    %1 = vector.load %arg2[%c0_1, %c0_2] : memref<128x128xbf16, #tpu.memory_space<vmem>>, vector<128x128xbf16>
    %cst = arith.constant dense<0.000000e+00> : vector<64x128xf32>
    %2 = tpu.matmul %0, %1, %cst {dimension_numbers = #tpu.dot_dimension_numbers<[1], [0], [0], [1], [0, 0, 1, 1], [], []>} : vector<64x128xbf16>, vector<128x128xbf16>, vector<64x128xf32> -> vector<64x128xf32>
    %c0_3 = arith.constant 0 : index
    %c0_4 = arith.constant 0 : index
    %3 = vector.load %arg3[%c0_3, %c0_4] : memref<1x128xf32, #tpu.memory_space<vmem>>, vector<1x128xf32>
    %4 = vector.broadcast %3 : vector<1x128xf32> to vector<64x128xf32>
    %5 = arith.addf %2, %4 : vector<64x128xf32>
    %cst_5 = arith.constant 0.000000e+00 : f32
    %6 = vector.broadcast %cst_5 : f32 to vector<64x128xf32>
    %7 = arith.maximumf %5, %6 : vector<64x128xf32>
    %8 = arith.truncf %7 : vector<64x128xf32> to vector<64x128xbf16>
    %c0_6 = arith.constant 0 : index
    %c0_7 = arith.constant 0 : index
    %9 = vector.load %arg4[%c0_6, %c0_7] : memref<64x128xbf16, #tpu.memory_space<vmem>>, vector<64x128xbf16>
    tpu.vector_store %arg4[%c0_6, %c0_7], %8 {strides = array<i32>} : memref<64x128xbf16, #tpu.memory_space<vmem>>, vector<64x128xbf16>,
    return
  }
  func.func @transform_0(%arg0: i32) -> (i32, i32) {
    %c0_i32 = arith.constant 0 : i32
    %c0_i32_0 = arith.constant 0 : i32
    return %arg0, %c0_i32 : i32, i32
  }
  func.func @transform_1(%arg0: i32) -> (i32, i32) {
    %c0_i32 = arith.constant 0 : i32
    %c0_i32_0 = arith.constant 0 : i32
    %c0_i32_1 = arith.constant 0 : i32
    return %c0_i32, %c0_i32_0 : i32, i32
  }
  func.func @transform_2(%arg0: i32) -> (i32, i32) {
    %c0_i32 = arith.constant 0 : i32
    %c0_i32_0 = arith.constant 0 : i32
    %c0_i32_1 = arith.constant 0 : i32
    return %c0_i32, %c0_i32_0 : i32, i32
  }
  func.func @transform_3(%arg0: i32) -> (i32, i32) {
    %c0_i32 = arith.constant 0 : i32
    %c0_i32_0 = arith.constant 0 : i32
    return %arg0, %c0_i32 : i32, i32
  }
}

</mosaic_0001>

<bundles_post_ra>
// kernel: tpu_custom_call.1
= control target key start
LH: loop header
LB: loop body
LE: loop exit
PB: predicated region body
PF: predicated region fallthrough
CT: control target
= control target key end

     0   :  { %8 = vsyncpa [#allocation3], 0  ;;  %s1092_s0 = inlined_call_operand.hbm [shape: bf16[128,128], index: 0, kind: input, shape index: {}]   ;;  %s1093_s1 = inlined_call_operand.hbm [shape: bf16[128,128], index: 1, kind: input, shape index: {}]   ;;  %s1094_s2 = inlined_call_operand.vmem [shape: f32[1,128], index: 2, kind: input, shape index: {}]   ;;  %s1095_s3 = inlined_call_operand.hbm [shape: bf16[128,128], index: 3, kind: output, shape index: {}]  }
   0x1   :  { %10 = vsyncpa [#allocation3 + $0x1], 0 }
   0x2   :  { %11 = vsyncpa [#allocation6], 0 }
   0x3   :  { %12 = vsyncpa [#allocation4], 0 }
   0x4   :  { %14 = vsyncpa [#allocation4 + $0x1], 0  ;;  %s872_s12 = smov 0   ;;  %s874_s13 = smov 0  }
   0x5   :  { %s876_s14 = smov 0   ;;  %s878_s15 = smov 0  }
   0x6 LB: > { %s893_s16 = sadd.s32 4294967295, %s843_s15   ;;  %s520_s17 = sadd.s32 4294967294, %s843_s15   ;;  %s843_s15 = sphi %s878_s15, %s1115_s15   ;;  %s839_s14 = sphi %s876_s14, %s1114_s14   ;;  %s835_s13 = sphi %s874_s13, %s1113_s13   ;;  %s831_s12 = sphi %s872_s12, %s1112_s12  }
   0x7   : > { %p40_p0 = scmp.ne.s32.totalorder %s835_s13, %s831_s12  ;;  %p1096_p1 = scmp.eq.s32.totalorder %s893_s16, 0 }
   0x8   : > { %p112_p3 = scmp.eq.s32.totalorder %s520_s17, 1  ;;  %p521_p5 = scmp.ge.s32.totalorder %s843_s15, 1 }
   0x9   : > { %p902_p4 = por %p1096_p1, %p40_p0  ;;  %p119_p7 = scmp.lt.s32.totalorder %s843_s15, 3 }
   0xa   : > { %p907_p6 = por %p112_p3, %p40_p0  ;;  %s845_s21 = smov [#allocation5]  }
   0xb   : > { %s1099_s18 = scalar_select %p902_p4, 1, 0 }
   0xc   : > { %s1100_s19 = scalar_select %p907_p6, 1, 0 }
   0xd   : > { %p912_p8 = pnand %p521_p5, %p119_p7  ;;  %s131_s22 = sshll.u32 %s845_s21, 4  ;;  %s916_s22 = int_to_ptr.vmem [resolvable:$true] %s131_s22 }
   0xe   : > { %s928_s24 = sadd.s32 1, %s843_s15   ;;  %s27_s25 = sadd.s32 1, %s839_s14 }
   0xf   : > { %s1101_s20 = scalar_select %p912_p8, 1, 0 }
  0x10   : > { %p650_p9 = pneg %p912_p8  ;;  %s24_s26 = ssub.s32 %s843_s15, %s928_s24 }
  0x11   : > { %s715_s29 = scalar_lea.hbm %s1093_s1, 1024 }
  0x12   : > { %p923_p11 = pnand %p650_p9, %p1096_p1  ;;  %p716_p12 = scmp.ne.s32.totalorder %s1093_s1, %s715_s29 }
  0x13   : > { %p722_p5 = scmp.lt.u32.totalorder %s715_s29, %s1093_s1 }
  0x14   : > { %p717_p13 = pneg %p923_p11 }
  0x16   : > { %p718_p0 = pnand %p717_p13, %p716_p12 }
  0x18   : > { %p719_p3 = pneg %p718_p0 }
  0x1a   : > { %p724_p7 = pnand %p722_p5, %p719_p3 }
  0x1c   : > { %727 = shalt.err (!%p724_p7)
}
  0x1d   : > { %s728_s7 = scalar_lea.vmem %s916_s22, 1024  ;;  %p736_p2 = scmp.lt.s32.totalorder %s916_s22, %s916_s22 }
  0x1e   : > { %p729_p9 = scmp.ne.s32.totalorder %s916_s22, %s728_s7  ;;  %p737_p6 = scmp.lt.s32.totalorder %s728_s7, %s728_s7 }
  0x20   : > { %p731_p10 = pnand %p729_p9, %p717_p13  ;;  %p738_p4 = por %p737_p6, %p736_p2 }
  0x22   : > { %p732_p1 = pneg %p731_p10 }
  0x24   : > { %p739_p8 = pnand %p738_p4, %p732_p1 }
  0x26   : > { %742 = shalt.err (!%p739_p8)
}
  0x27   : > { %s846_s8 = smov 64   ;;  %s847_s9 = smov 4  }
  0x28   : > { %653 = dma.hbm_to_vmem [thread:$0]  (!%p923_p11), %s1093_s1, 1024, %s916_s22, [#allocation6], %s846_s8, %s846_s8, %s847_s9  }
  0x29   : > { %p25_p1 = scmp.eq.s32.totalorder %s24_s26, 0  ;;  %p34_p2 = scmp.ne.s32.totalorder %s839_s14, %s835_s13 }
  0x2a   : > { %p35_p4 = scmp.eq.s32.totalorder %s843_s15, 0  ;;  %p663_p6 = scmp.lt.s32.totalorder %s843_s15, 2 }
  0x2b   : > { %s962_s17 = scalar_select %p25_p1, %s839_s14, %s27_s25  }
  0x2c   : > { %p36_p8 = por %p35_p4, %p34_p2  ;;  %p1103_p10 = scmp.eq.s32.totalorder %s893_s16, 1 }
  0x2d   : > { %s148_s23 = sand.u32 1, %s839_s14   ;;  %s557_s27 = sshll.u32 %s843_s15, 9 }
  0x2e   : > { %p966_p12 = por %p1103_p10, %p34_p2  ;;  %s524_s28 = sshll.u32 %s148_s23, 5 }
  0x2f   : > { %s975_s4 = scalar_lea.hbm %s1092_s0, %s557_s27  ;;  %s152_s22 = scalar_lea.vmem [#allocation2], %s524_s28 }
  0x30   : > { %s159_s25 = sshll.u32 %s152_s22, 4  ;;  %p977_p11 = pnand %p663_p6, %p36_p8  ;;  %s981_s25 = int_to_ptr.vmem [resolvable:$true] %s159_s25 }
  0x31   : > { %s983_s5 = scalar_lea.sflag [#allocation3], %s148_s23  ;;  %s743_s6 = scalar_lea.hbm %s975_s4, 512 }
  0x32   : > { %p744_p13 = scmp.ne.s32.totalorder %s975_s4, %s743_s6  ;;  %p745_p0 = pneg %p977_p11 }
  0x33   : > { %s748_s11 = scalar_lea.hbm %s1092_s0, 1024  ;;  %p749_p7 = scmp.lt.u32.totalorder %s975_s4, %s1092_s0 }
  0x34   : > { %p746_p3 = pnand %p745_p0, %p744_p13  ;;  %p750_p9 = scmp.lt.u32.totalorder %s748_s11, %s743_s6 }
  0x35   : > { %p752_p2 = scmp.lt.u32.totalorder %s743_s6, %s975_s4 }
  0x36   : > { %p747_p5 = pneg %p746_p3  ;;  %p751_p1 = por %p750_p9, %p749_p7 }
  0x38   : > { %p753_p4 = por %p752_p2, %p751_p1 }
  0x3a   : > { %p754_p6 = pnand %p753_p4, %p747_p5 }
  0x3c   : > { %757 = shalt.err (!%p754_p6)
}
  0x3d   : > { %s758_s23 = scalar_lea.vmem %s981_s25, 512  ;;  %s848_s29 = smov [#allocation2]  }
  0x3e   : > { %p759_p8 = scmp.ne.s32.totalorder %s981_s25, %s758_s23  ;;  %s763_s30 = sshll.u32 %s848_s29, 4  ;;  %s764_s30 = int_to_ptr.vmem [resolvable:$false] %s763_s30 }
  0x3f   : > { %s765_s22 = scalar_lea.vmem %s764_s30, 1024  ;;  %p766_p3 = scmp.lt.s32.totalorder %s981_s25, %s764_s30 }
  0x40   : > { %p761_p10 = pnand %p759_p8, %p745_p0  ;;  %p767_p7 = scmp.lt.s32.totalorder %s765_s22, %s758_s23 }
  0x42   : > { %p762_p13 = pneg %p761_p10  ;;  %p768_p9 = por %p767_p7, %p766_p3 }
  0x44   : > { %p769_p1 = pnand %p768_p9, %p762_p13 }
  0x46   : > { %772 = shalt.err (!%p769_p1)
}
  0x47   : > { %657 = dma.hbm_to_vmem [thread:$0]  (!%p977_p11), %s975_s4, 512, %s981_s25, %s983_s5, %s846_s8, %s846_s8, %s847_s9  }
  0x48   : > { %p1106_p0 = scmp.ne.s32.totalorder %s1101_s20, 0 }
  0x49   : > { %s1017_s6 = sand.u32 (!%p1106_p0), 1, %s835_s13   ;;  %p1107_p5 = scmp.ne.s32.totalorder (!%p1106_p0), %s1099_s18, 0 }
  0x4a   : > { %171 = sbr.rel (%p1106_p0) target bundleno = 354 (0x162), region = 32  ;;  %s528_s7 = sshll.u32 (!%p1106_p0), %s1017_s6, 5 }
  0x4b   : > { %s174_s10 = scalar_lea.sflag (!%p1106_p0), [#allocation3], %s1017_s6  ;;  %s1023_s26 = scalar_lea.vmem (!%p1106_p0), [#allocation2], %s528_s7 }
  0x51   : > { %818 = dma.done.wait (%p1107_p5), %s174_s10, 512  }
  0x52   : > { %820 = vsyncadd (%p1107_p5), %s174_s10, 4294966784  ;;  %p1108_p11 = scmp.eq.s32.totalorder %s893_s16, 0 }
  0x54   : > { %822 = dma.done.wait (%p1108_p11), [#allocation6], 1024   ;;  %p1109_p2 = pmov %p1108_p11 }
  0x55   : > { %v703_v0 = vld [vmem:[#allocation5] sm:$0xff]   ;;  %v704_v1 = vld [vmem:[#allocation5 + $0x8] sm:$0xff]   ;;  %v705_v2 = vld [vmem:[#allocation5 + $0x10] sm:$0xff]   ;;  %s203_s8 = scalar_lea.vmem [#allocation7], %s528_s7  ;;  %s566_s4 = sshll.u32 %s893_s16, 9 }
  0x56   : > { %824 = vsyncadd (%p1109_p2), [#allocation6], 4294966272  ;;  %602 = vmatprep.subr.bf16.mxu0 %v703_v0  ;;  %626 = vmatprep.subr.bf16.mxu1 %v703_v0  ;;  %v706_v3 = vld [vmem:[#allocation5 + $0x18] sm:$0xff]   ;;  %v711_v4 = vld [vmem:[%s1023_s26] sm:$0xff]   ;;  %s437_s9 = sshll.u32 %s203_s8, 4  ;;  %s1048_s16 = scalar_lea.hbm %s1095_s3, %s566_s4  ;;  %s1043_s9 = int_to_ptr.vmem [resolvable:$true] %s437_s9 }
  0x57   : > { %603 = vmatpush3.bf16.msra.mxu0 %v703_v0  ;;  %634 = vmatpush3.bf16.msra.mxu1 %v703_v0  ;;  %v712_v5 = vld [vmem:[%s1023_s26 + $0x10] sm:$0xff]   ;;  %v707_v6 = vld [vmem:[#allocation5 + $0x20] sm:$0xff]   ;;  %v708_v7 = vld [vmem:[#allocation5 + $0x28] sm:$0xff]   ;;  %s424_s11 = scalar_lea.sflag [#allocation4], %s1017_s6  ;;  %s773_s27 = scalar_lea.vmem %s1043_s9, 512 }
  0x58   : > { %604 = vmatprep.subr.bf16.mxu0 %v704_v1  ;;  %627 = vmatprep.subr.bf16.mxu1 %v704_v1  ;;  %v709_v8 = vld [vmem:[#allocation5 + $0x30] sm:$0xff]   ;;  %v710_v9 = vld [vmem:[#allocation5 + $0x38] sm:$0xff]   ;;  %v713_v10 = vld [vmem:[%s1023_s26 + $0x8] sm:$0xff]   ;;  %p774_p4 = scmp.ne.s32.totalorder %s1043_s9, %s773_s27  ;;  %s849_s28 = smov [#allocation7]  }
  0x59   : > { %618 = vmatprep.mubr.bf16.mxu0 %v711_v4  ;;  %622 = vmatprep.mubr.bf16.mxu1 %v712_v5  ;;  %v714_v11 = vld [vmem:[%s1023_s26 + $0x18] sm:$0xff]   ;;  %v531_v12 = vld [vmem:[%s1094_s2] ss:$0 sm:$0xff]  ;;  %s777_s23 = sshll.u32 %s849_s28, 4  ;;  %s778_s23 = int_to_ptr.vmem [resolvable:$false] %s777_s23 }
  0x5a   : > { %p775_p6 = pnand %p774_p4, %p966_p12  ;;  %s779_s29 = scalar_lea.vmem %s778_s23, 1024 }
  0x5b   : > { %605 = vmatpush3.bf16.msra.mxu0 %v704_v1  ;;  %635 = vmatpush3.bf16.msra.mxu1 %v704_v1  ;;  %p780_p10 = scmp.lt.s32.totalorder %s1043_s9, %s778_s23  ;;  %p781_p13 = scmp.lt.s32.totalorder %s779_s29, %s773_s27 }
  0x5c   : > { %606 = vmatprep.subr.bf16.mxu0 %v705_v2  ;;  %628 = vmatprep.subr.bf16.mxu1 %v705_v2  ;;  %p776_p8 = pneg %p775_p6 }
  0x5d   : > { %p782_p3 = por %p781_p13, %p780_p10 }
  0x5f   : > { %607 = vmatpush3.bf16.msra.mxu0 %v705_v2  ;;  %636 = vmatpush3.bf16.msra.mxu1 %v705_v2  ;;  %p783_p7 = pnand %p782_p3, %p776_p8 }
  0x60   : > { %608 = vmatprep.subr.bf16.mxu0 %v706_v3  ;;  %629 = vmatprep.subr.bf16.mxu1 %v706_v3 }
  0x63   : > { %609 = vmatpush3.bf16.msra.mxu0 %v706_v3  ;;  %637 = vmatpush3.bf16.msra.mxu1 %v706_v3 }
  0x64   : > { %610 = vmatprep.subr.bf16.mxu0 %v707_v6  ;;  %630 = vmatprep.subr.bf16.mxu1 %v707_v6 }
  0x67   : > { %611 = vmatpush3.bf16.msra.mxu0 %v707_v6  ;;  %638 = vmatpush3.bf16.msra.mxu1 %v707_v6 }
  0x68   : > { %612 = vmatprep.subr.bf16.mxu0 %v708_v7  ;;  %631 = vmatprep.subr.bf16.mxu1 %v708_v7 }
  0x6b   : > { %613 = vmatpush3.bf16.msra.mxu0 %v708_v7  ;;  %639 = vmatpush3.bf16.msra.mxu1 %v708_v7 }
  0x6c   : > { %614 = vmatprep.subr.bf16.mxu0 %v709_v8  ;;  %632 = vmatprep.subr.bf16.mxu1 %v709_v8 }
  0x6f   : > { %615 = vmatpush3.bf16.msra.mxu0 %v709_v8  ;;  %640 = vmatpush3.bf16.msra.mxu1 %v709_v8 }
  0x70   : > { %616 = vmatprep.subr.bf16.mxu0 %v710_v9  ;;  %633 = vmatprep.subr.bf16.mxu1 %v710_v9 }
  0x73   : > { %617 = vmatpush3.bf16.msra.mxu0 %v710_v9  ;;  %641 = vmatpush3.bf16.msra.mxu1 %v710_v9 }
  0x76   : > { %619 = vmatmul.mubr.bf16.vlgmr.msra.gmra.mrb[0].mxu0 %v713_v10  ;;  %623 = vmatmul.mubr.bf16.vlgmr.msra.gmra.mrb[0].mxu1 %v714_v11 }
 0x149   : > { %v620_v13 = vpop.f32.mrb[0].mxu0  ;;  %v624_v14 = vpop.f32.mrb[0].mxu1 }
 0x14a   : > { %v353_v15 = vadd.f32 %v620_v13, %v531_v12  ;;  %v369_v16 = vadd.f32 %v624_v14, %v531_v12  ;;  %v344_v17 = vpop.f32.mrb[1].mxu0  ;;  %v360_v18 = vpop.f32.mrb[1].mxu1 }
 0x14b   : > { %v345_v19 = vadd.f32 %v531_v12, %v344_v17  ;;  %v361_v20 = vadd.f32 %v531_v12, %v360_v18  ;;  %v621_v21 = vpop.f32.mrb[2].mxu0  ;;  %v625_v22 = vpop.f32.mrb[2].mxu1 }
 0x14c   : > { %v356_v23 = vadd.f32 %v621_v21, %v531_v12  ;;  %v372_v24 = vadd.f32 %v625_v22, %v531_v12  ;;  %v347_v25 = vpop.f32.mrb[3].mxu0  ;;  %v363_v26 = vpop.f32.mrb[3].mxu1  ;;  %v377_v29 = vmax.f32 %v353_v15, 0.0  ;;  %v381_v30 = vmax.f32 %v369_v16, 0.0 }
 0x14d   : > { %v348_v27 = vadd.f32 %v531_v12, %v347_v25  ;;  %v364_v28 = vadd.f32 %v531_v12, %v363_v26  ;;  %v375_v33 = vmax.f32 %v345_v19, 0.0  ;;  %v379_v34 = vmax.f32 %v361_v20, 0.0 }
 0x14e   : > { %v378_v31 = vmax.f32 %v356_v23, 0.0  ;;  %v382_v32 = vmax.f32 %v372_v24, 0.0 }
 0x14f   : > { %v376_v35 = vmax.f32 %v348_v27, 0.0  ;;  %v380_v36 = vmax.f32 %v364_v28, 0.0 }
 0x150   : > { %v575_v37 = vpack.c.bf16 %v378_v31, %v377_v29  ;;  %v585_v38 = vpack.c.bf16 %v382_v32, %v381_v30 }
 0x151   : > { %v570_v39 = vpack.c.bf16 %v376_v35, %v375_v33  ;;  %v580_v40 = vpack.c.bf16 %v380_v36, %v379_v34 }
 0x152   : > { %587 = vst [vmem:[%s203_s8 + $0x8] sm:$0xff] %v575_v37   ;;  %589 = vst [vmem:[%s203_s8 + $0x18] sm:$0xff] %v585_v38  }
 0x153   : > { %571 = vst [vmem:[%s203_s8] sm:$0xff] %v570_v39   ;;  %588 = vst [vmem:[%s203_s8 + $0x10] sm:$0xff] %v580_v40  }
 0x154   : > { %786 = shalt.err (!%p783_p7)
}
 0x155   : > { %s787_s30 = scalar_lea.hbm %s1048_s16, 512  ;;  %s791_s10 = scalar_lea.hbm %s1095_s3, 1024 }
 0x156   : > { %p788_p9 = scmp.ne.s32.totalorder %s1048_s16, %s787_s30  ;;  %p792_p5 = scmp.lt.u32.totalorder %s1048_s16, %s1095_s3 }
 0x157   : > { %p793_p11 = scmp.lt.u32.totalorder %s791_s10, %s787_s30  ;;  %p795_p4 = scmp.lt.u32.totalorder %s787_s30, %s1048_s16 }
 0x158   : > { %p789_p1 = pnand %p788_p9, %p966_p12 }
 0x159   : > { %p794_p2 = por %p793_p11, %p792_p5 }
 0x15a   : > { %p790_p0 = pneg %p789_p1 }
 0x15b   : > { %p796_p6 = por %p795_p4, %p794_p2 }
 0x15d   : > { %p797_p8 = pnand %p796_p6, %p790_p0 }
 0x15f   : > { %800 = shalt.err (!%p797_p8)
}
 0x160   : > { %s850_s20 = smov 64   ;;  %s851_s8 = smov 4  }
 0x161   : > { %648 = dma.vmem_to_hbm [thread:$0]  (%p966_p12), %s1043_s9, 512, %s1048_s16, %s424_s11, %s850_s20, %s850_s20, %s851_s8  }
 0x162 PF: > { %s452_s4 = sand.u32 1, %s831_s12   ;;  %p1110_p10 = scmp.ne.s32.totalorder %s1100_s19, 0 }
 0x163   : > { %p1111_p13 = scmp.ge.s32.totalorder %s843_s15, 2  ;;  %s453_s25 = scalar_lea.sflag [#allocation4], %s452_s4 }
 0x165   : > { %p659_p3 = pnand %p1111_p13, %p1110_p10 }
 0x167   : > { %826 = dma.done.wait (!%p659_p3), %s453_s25, 512  }
 0x168   : > { %828 = vsyncadd (!%p659_p3), %s453_s25, 4294966784  ;;  %p17_p7 = scmp.ge.s32.totalorder %s928_s24, 4   ;;  %s1112_s12 = smov %s835_s13 }
 0x169   : > { %s1113_s13 = smov %s839_s14  ;;  %s1114_s14 = smov %s962_s17 }
 0x16a   : > { %s1115_s15 = smov %s928_s24  ;;  %19 = sbr.rel (!%p17_p7) target bundleno = 6 (0x6), region = 81 }
 0x171   :  { %458 = vsyncpa [#allocation3], 1 }
 0x172   :  { %460 = vsyncpa [#allocation3 + $0x1], 1 }
 0x173   :  { %461 = vsyncpa [#allocation6], 1 }
 0x174   :  { %462 = vsyncpa [#allocation4], 1 }
 0x175   :  { %464 = vsyncpa [#allocation4 + $0x1], 1 }

</bundles_post_ra>
